<compile_context>
chip_gen: v6e
topology: v6e:2x2x1
jax: 0.10.0
libtpu: 0.0.40
codegen_flags: <defaults>
</compile_context>

<pallas_src>
import math

import jax
import jax.numpy as jnp
from jax.experimental import pallas as pl
from jax.experimental.pallas import tpu as pltpu

_MiB = 1024 * 1024
_LANES = 128
_MAX_PACKED_TILE_ROWS = 8192       # hard cap on packed rows per grid step


def _cdiv(a, b):
    return (a + b - 1) // b


def _round_up(x, m):
    return _cdiv(x, m) * m


def _lane_pad(n):
    return _round_up(n, _LANES)


def _sublane_multiple(dtype):
    return {4: 8, 2: 16, 1: 32}.get(jnp.dtype(dtype).itemsize, 8)


def _vmem_budget(user_limit=None):
    """Return (footprint_budget_bytes, vmem_limit_bytes) for this TPU generation."""
    phys = None
    try:
        phys = getattr(pltpu.get_tpu_info(), "vmem_capacity_bytes", None)
    except Exception:
        phys = None
    if phys is None or phys <= 0:
        # Unknown hardware: stay inside every default scoped-VMEM limit.
        budget, limit = 12 * _MiB, None
    else:
        # 128 MiB physical (v5e/v6e) -> 28 MiB budget; 64 MiB (v7x) -> 24 MiB.
        budget = min(28 * _MiB, max(12 * _MiB, (phys * 3) // 8))
        limit = min(budget + 16 * _MiB, phys - 8 * _MiB) if budget > 12 * _MiB else None
    if user_limit is not None:
        limit = int(user_limit)
        budget = min(budget, max(4 * _MiB, (limit * 5) // 8))
    return budget, limit


def _combination_kernel(d_ref, w1_ref, b1_ref, w2_ref, b2_ref, o_ref):
    # d_ref:  (bt_p, r*D)   packed batch tile (r logical rows per packed row)
    # w1_ref: (r*D, r*5)    block-diagonal W1^T (d's dtype -> native MXU path)
    # b1_ref: (1, r*5)      tiled b1 (f32)
    # w2_ref: (r*5, r)      block-diagonal W2^T (f32)
    # b2_ref: (1, 1)        f32
    # o_ref:  (bt_p, r)     packed gamma (f32)
    h = jnp.dot(d_ref[...], w1_ref[...], preferred_element_type=jnp.float32)
    h = jnp.maximum(h + b1_ref[...], 0.0)
    g = jnp.dot(h, w2_ref[...], preferred_element_type=jnp.float32)
    g = jnp.maximum(g + b2_ref[...], 0.0)
    o_ref[...] = jnp.exp(-g).astype(o_ref.dtype)


def combination_forward(d, W1, b1, W2, b2, *, batch_tile=None, vmem_limit_bytes=None):
    """Pallas implementation of Combination.forward.

    d: (B, D) float32 or bfloat16; W1: (5, D), b1: (5,), W2: (1, 5), b2: (1,)
    returns gamma: (B, 1) float32
    """
    d = jnp.asarray(d)
    W1 = jnp.asarray(W1, jnp.float32)
    b1 = jnp.asarray(b1, jnp.float32)
    W2 = jnp.asarray(W2, jnp.float32)
    b2 = jnp.asarray(b2, jnp.float32)

    B, D = d.shape
    H1 = W1.shape[0]                    # 5
    H2 = W2.shape[0]                    # 1
    itemsize = jnp.dtype(d.dtype).itemsize
    sub = _sublane_multiple(d.dtype)

    # Packing factor: fold r consecutive batch rows into the 128-lane axis.
    r = max(1, _LANES // D) if D <= _LANES else 1
    packed_cols = r * D                 # lane width of a packed d row
    hid_cols = r * H1                   # lane width of packed hidden activations
    out_cols = r * H2                   # lane width of packed gamma

    # One-time packed-weight prep in XLA (outside the kernel).
    eye_r = jnp.eye(r, dtype=jnp.float32)
    W1p = jnp.kron(eye_r, W1.T).astype(d.dtype)      # (r*D, r*H1), bf16 if d is bf16
    b1p = jnp.tile(b1, r).reshape(1, hid_cols)       # (1, r*H1) f32
    W2p = jnp.kron(eye_r, W2.T)                      # (r*H1, r*H2) f32
    b2p = b2.reshape(1, 1)                           # (1, 1) f32

    rows_needed = _cdiv(B, r)                        # packed rows of real data
    budget, vmem_limit = _vmem_budget(vmem_limit_bytes)

    if batch_tile is not None:
        bt_p = max(sub, _round_up(_cdiv(int(batch_tile), r), sub))
    else:
        # Footprint per packed row: double-buffered d + gamma blocks (lane padded)
        # plus the f32 intermediates the compiler materializes in VMEM.
        per_row = (2 * _lane_pad(packed_cols) * itemsize   # d, double buffered
                   + 2 * _lane_pad(out_cols) * 4           # gamma, double buffered
                   + 2 * _lane_pad(hid_cols) * 4           # h / relu(h) temps
                   + _lane_pad(out_cols) * 4)              # g temp
        weight_bytes = 2 * (_round_up(packed_cols, sub) * _lane_pad(hid_cols) * itemsize
                            + _round_up(hid_cols, 8) * _lane_pad(out_cols) * 4
                            + 8 * _lane_pad(hid_cols) * 4
                            + 8 * _LANES * 4)
        avail = max(per_row * sub, budget - weight_bytes - _MiB)
        bt_p = max(sub, (avail // per_row) // sub * sub)
        bt_p = min(bt_p, _MAX_PACKED_TILE_ROWS)
        # Big batches: force >= 2 grid steps so both v7x TensorCores get work
        # (extra step overhead is noise at this size; no cost on v5e/v6e).
        if rows_needed * _lane_pad(packed_cols) * itemsize >= 4 * _MiB:
            bt_p = min(bt_p, _round_up(_cdiv(rows_needed, 2), sub))
        bt_p = max(sub, min(bt_p, _round_up(rows_needed, sub)))

    num_tiles = _cdiv(rows_needed, bt_p)
    B_pad = num_tiles * bt_p * r

    d_p = d if B_pad == B else jnp.pad(d, ((0, B_pad - B), (0, 0)))
    d_p = d_p.reshape(B_pad // r, packed_cols)       # contiguous merge: free

    out = pl.pallas_call(
        _combination_kernel,
        out_shape=jax.ShapeDtypeStruct((B_pad // r, out_cols), jnp.float32),
        grid_spec=pltpu.PrefetchScalarGridSpec(
            num_scalar_prefetch=0,
            grid=(num_tiles,),
            in_specs=[
                pl.BlockSpec((bt_p, packed_cols), lambda i: (i, 0)),     # d stream
                pl.BlockSpec((packed_cols, hid_cols), lambda i: (0, 0)),  # W1p
                pl.BlockSpec((1, hid_cols), lambda i: (0, 0)),            # b1p
                pl.BlockSpec((hid_cols, out_cols), lambda i: (0, 0)),     # W2p
                pl.BlockSpec((1, 1), lambda i: (0, 0)),                   # b2
            ],
            out_specs=pl.BlockSpec((bt_p, out_cols), lambda i: (i, 0)),
        ),
        compiler_params=pltpu.CompilerParams(
            dimension_semantics=("parallel",),       # shard tiles across TCs (v7x)
            vmem_limit_bytes=vmem_limit,
        ),
    )(d_p, W1p, b1p, W2p, b2p)

    # Packed (B_pad/r, r*H2) -> (B_pad, H2) is another free contiguous reshape.
    return out.reshape(B_pad, H2)[:B]


def init_combination_params(key, input_size):
    """uniform(-stdv, stdv) init; stdv1 = 1/sqrt(5), stdv2 = 1/sqrt(1)."""
    k1, k2, k3, k4 = jax.random.split(key, 4)
    stdv1 = 1.0 / math.sqrt(5.0)
    stdv2 = 1.0 / math.sqrt(1.0)
    W1 = jax.random.uniform(k1, (5, input_size), jnp.float32, -stdv1, stdv1)
    b1 = jax.random.uniform(k2, (5,), jnp.float32, -stdv1, stdv1)
    W2 = jax.random.uniform(k3, (1, 5), jnp.float32, -stdv2, stdv2)
    b2 = jax.random.uniform(k4, (1,), jnp.float32, -stdv2, stdv2)
    return W1, b1, W2, b2


def _reference_forward(d, W1, b1, W2, b2):
    h = jnp.maximum(d @ W1.T + b1, 0.0)
    g = jnp.maximum(h @ W2.T + b2, 0.0)
    return jnp.exp(-g)


if __name__ == "__main__":
    key = jax.random.PRNGKey(0)
    k_params, k_d1, k_d2, k_d3, k_params4, k_d4 = jax.random.split(key, 6)

    input_size = 32
    W1, b1, W2, b2 = init_combination_params(k_params, input_size)

    # Case 1: small batch, auto tiling, packed path (r = 4 at D = 32).
    d1 = jax.random.normal(k_d1, (8, input_size), jnp.float32)
    g1 = jax.block_until_ready(combination_forward(d1, W1, b1, W2, b2))
    ref1 = _reference_forward(d1, W1, b1, W2, b2)
    assert g1.shape == (8, 1)
    assert jnp.allclose(g1, ref1, atol=1e-5, rtol=1e-5), "mismatch (case 1)"

    # Case 2: ragged batch + explicit small tile -> multi-step grid + padding.
    d2 = jax.random.normal(k_d2, (50, input_size), jnp.float32)
    g2 = jax.block_until_ready(
        combination_forward(d2, W1, b1, W2, b2, batch_tile=16))
    ref2 = _reference_forward(d2, W1, b1, W2, b2)
    assert g2.shape == (50, 1)
    assert jnp.allclose(g2, ref2, atol=1e-5, rtol=1e-5), "mismatch (case 2)"

    # Case 3: bf16 input -> native bf16 MXU path (W1 packed to bf16, f32 accum).
    d3 = jax.random.normal(k_d3, (64, input_size), jnp.float32).astype(jnp.bfloat16)
    g3 = jax.block_until_ready(combination_forward(d3, W1, b1, W2, b2))
    ref3 = _reference_forward(d3.astype(jnp.float32),
                              W1.astype(jnp.bfloat16).astype(jnp.float32), b1, W2, b2)
    assert g3.shape == (64, 1)
    assert jnp.allclose(g3, ref3, atol=2e-3, rtol=2e-3), "mismatch (case 3)"

    # Case 4: D that does not pack cleanly (r = 1 fallback path).
    input_size4 = 96
    W1b, b1b, W2b, b2b = init_combination_params(k_params4, input_size4)
    d4 = jax.random.normal(k_d4, (24, input_size4), jnp.float32)
    g4 = jax.block_until_ready(combination_forward(d4, W1b, b1b, W2b, b2b))
    ref4 = _reference_forward(d4, W1b, b1b, W2b, b2b)
    assert g4.shape == (24, 1)
    assert jnp.allclose(g4, ref4, atol=1e-5, rtol=1e-5), "mismatch (case 4)"

    print("KERNEL_OK")
</pallas_src>

<mosaic_0001>
module attributes {stable_mosaic.version = 11 : i64} {
  func.func @_combination_kernel(%arg0: i32, %arg1: memref<8x128xf32, #tpu.memory_space<vmem>>, %arg2: memref<128x20xf32, #tpu.memory_space<vmem>>, %arg3: memref<1x20xf32, #tpu.memory_space<vmem>>, %arg4: memref<20x4xf32, #tpu.memory_space<vmem>>, %arg5: memref<1x1xf32, #tpu.memory_space<vmem>>, %arg6: memref<8x4xf32, #tpu.memory_space<vmem>>) attributes {dimension_semantics = [#tpu.dimension_semantics<parallel>], iteration_bounds = array<i64: 1>, scalar_prefetch = 0 : i64, scratch_operands = 0 : i64, tpu.core_type = #tpu.core_type<tc>, window_params = [{transform_indices = @transform_0, window_bounds = array<i64: 8, 128>}, {pipeline_mode = #tpu.pipeline_mode<synchronous>, transform_indices = @transform_1, window_bounds = array<i64: 128, 20>}, {pipeline_mode = #tpu.pipeline_mode<synchronous>, transform_indices = @transform_2, window_bounds = array<i64: 1, 20>}, {pipeline_mode = #tpu.pipeline_mode<synchronous>, transform_indices = @transform_3, window_bounds = array<i64: 20, 4>}, {pipeline_mode = #tpu.pipeline_mode<synchronous>, transform_indices = @transform_4, window_bounds = array<i64: 1, 1>}, {transform_indices = @transform_5, window_bounds = array<i64: 8, 4>}]} {
    %c0 = arith.constant 0 : index
    %c0_0 = arith.constant 0 : index
    %0 = vector.load %arg1[%c0, %c0_0] : memref<8x128xf32, #tpu.memory_space<vmem>>, vector<8x128xf32>
    %c0_1 = arith.constant 0 : index
    %c0_2 = arith.constant 0 : index
    %1 = vector.load %arg2[%c0_1, %c0_2] : memref<128x20xf32, #tpu.memory_space<vmem>>, vector<128x20xf32>
    %cst = arith.constant dense<0.000000e+00> : vector<8x20xf32>
    %2 = tpu.matmul %0, %1, %cst {dimension_numbers = #tpu.dot_dimension_numbers<[1], [0], [0], [1], [0, 0, 1, 1], [], []>} : vector<8x128xf32>, vector<128x20xf32>, vector<8x20xf32> -> vector<8x20xf32>
    %c0_3 = arith.constant 0 : index
    %c0_4 = arith.constant 0 : index
    %3 = vector.load %arg3[%c0_3, %c0_4] : memref<1x20xf32, #tpu.memory_space<vmem>>, vector<1x20xf32>
    %4 = vector.broadcast %3 : vector<1x20xf32> to vector<8x20xf32>
    %5 = arith.addf %2, %4 : vector<8x20xf32>
    %cst_5 = arith.constant 0.000000e+00 : f32
    %6 = vector.broadcast %cst_5 : f32 to vector<8x20xf32>
    %7 = arith.maximumf %5, %6 : vector<8x20xf32>
    %c0_6 = arith.constant 0 : index
    %c0_7 = arith.constant 0 : index
    %8 = vector.load %arg4[%c0_6, %c0_7] : memref<20x4xf32, #tpu.memory_space<vmem>>, vector<20x4xf32>
    %cst_8 = arith.constant dense<0.000000e+00> : vector<8x4xf32>
    %9 = tpu.matmul %7, %8, %cst_8 {dimension_numbers = #tpu.dot_dimension_numbers<[1], [0], [0], [1], [0, 0, 1, 1], [], []>} : vector<8x20xf32>, vector<20x4xf32>, vector<8x4xf32> -> vector<8x4xf32>
    %c0_9 = arith.constant 0 : index
    %c0_10 = arith.constant 0 : index
    %10 = vector.load %arg5[%c0_9, %c0_10] : memref<1x1xf32, #tpu.memory_space<vmem>>, vector<1x1xf32>
    %11 = vector.broadcast %10 : vector<1x1xf32> to vector<8x4xf32>
    %12 = arith.addf %9, %11 : vector<8x4xf32>
    %cst_11 = arith.constant 0.000000e+00 : f32
    %13 = vector.broadcast %cst_11 : f32 to vector<8x4xf32>
    %14 = arith.maximumf %12, %13 : vector<8x4xf32>
    %cst_12 = arith.constant 0.000000e+00 : f32
    %15 = vector.broadcast %cst_12 : f32 to vector<8x4xf32>
    %16 = arith.subf %15, %14 : vector<8x4xf32>
    %17 = math.exp %16 : vector<8x4xf32>
    %c0_13 = arith.constant 0 : index
    %c0_14 = arith.constant 0 : index
    %18 = vector.load %arg6[%c0_13, %c0_14] : memref<8x4xf32, #tpu.memory_space<vmem>>, vector<8x4xf32>
    tpu.vector_store %arg6[%c0_13, %c0_14], %17 {strides = array<i32>} : memref<8x4xf32, #tpu.memory_space<vmem>>, vector<8x4xf32>,
    return
  }
  func.func @transform_0(%arg0: i32) -> (i32, i32) {
    %c0_i32 = arith.constant 0 : i32
    %c0_i32_0 = arith.constant 0 : i32
    return %arg0, %c0_i32 : i32, i32
  }
  func.func @transform_1(%arg0: i32) -> (i32, i32) {
    %c0_i32 = arith.constant 0 : i32
    %c0_i32_0 = arith.constant 0 : i32
    %c0_i32_1 = arith.constant 0 : i32
    return %c0_i32, %c0_i32_0 : i32, i32
  }
  func.func @transform_2(%arg0: i32) -> (i32, i32) {
    %c0_i32 = arith.constant 0 : i32
    %c0_i32_0 = arith.constant 0 : i32
    %c0_i32_1 = arith.constant 0 : i32
    return %c0_i32, %c0_i32_0 : i32, i32
  }
  func.func @transform_3(%arg0: i32) -> (i32, i32) {
    %c0_i32 = arith.constant 0 : i32
    %c0_i32_0 = arith.constant 0 : i32
    %c0_i32_1 = arith.constant 0 : i32
    return %c0_i32, %c0_i32_0 : i32, i32
  }
  func.func @transform_4(%arg0: i32) -> (i32, i32) {
    %c0_i32 = arith.constant 0 : i32
    %c0_i32_0 = arith.constant 0 : i32
    %c0_i32_1 = arith.constant 0 : i32
    return %c0_i32, %c0_i32_0 : i32, i32
  }
  func.func @transform_5(%arg0: i32) -> (i32, i32) {
    %c0_i32 = arith.constant 0 : i32
    %c0_i32_0 = arith.constant 0 : i32
    return %arg0, %c0_i32 : i32, i32
  }
}

</mosaic_0001>

<bundles_post_ra>
// kernel: tpu_custom_call.1
= control target key start
LH: loop header
LB: loop body
LE: loop exit
PB: predicated region body
PF: predicated region fallthrough
CT: control target
= control target key end

     0   :  { %v293_v0 = vmov 0.0   ;;  %vm294_vm0 = vmmov 0   ;;  %vm134_vm1 = vcmask 1043456   ;;  %v295_v21 = vmov 0   ;;  %s395_s1 = inlined_call_operand.vmem [shape: f32[128,20], index: 1, kind: input, shape index: {}]   ;;  %s396_s0 = inlined_call_operand.vmem [shape: f32[8,128], index: 0, kind: input, shape index: {}]   ;;  %s397_s3 = inlined_call_operand.vmem [shape: f32[20,4], index: 3, kind: input, shape index: {}]   ;;  %s398_s4 = inlined_call_operand.<no memory space> [shape: f32[1,1], index: 4, kind: input, shape index: {}]   ;;  %s399_s2 = inlined_call_operand.vmem [shape: f32[1,20], index: 2, kind: input, shape index: {}]   ;;  %s400_s5 = inlined_call_operand.vmem [shape: f32[8,4], index: 5, kind: output, shape index: {}]  }
   0x1   :  { %243 = vmatprep.subr.mxu0 %v293_v0  ;;  %v38_v1 = vld [vmem:[%s395_s1 + $0x78] sm:$0xff]  ;;  %v37_v2 = vld [vmem:[%s395_s1 + $0x70] sm:$0xff]  ;;  %275 = vmatprep.mubr.msk.f32.mxu0 %vm294_vm0, %v293_v0  ;;  %v36_v3 = vld [vmem:[%s395_s1 + $0x68] sm:$0xff]  ;;  %v10_v22 = vstv %s398_s4  ;;  %vm130_vm2 = vcmask 162816   ;;  %vm212_vm3 = vcmask 31744  }
   0x2   :  { %244 = vmatpush3.msra.mxu0 %v38_v1  ;;  %278 = vmatprep.subr.mxu1 %v293_v0  ;;  %v35_v4 = vld [vmem:[%s395_s1 + $0x60] sm:$0xff]  ;;  %v34_v5 = vld [vmem:[%s395_s1 + $0x58] sm:$0xff]  ;;  %v33_v6 = vld [vmem:[%s395_s1 + $0x50] sm:$0xff]  ;;  %11 = vst [vmem:[#allocation2] sm:$0x1] %v10_v22 }
   0x3   :  { %245 = vmatprep.subr.mxu0 %v293_v0  ;;  %284 = vmatprep.mubr.msk.f32.mxu1 %vm294_vm0, %v293_v0  ;;  %v32_v7 = vld [vmem:[%s395_s1 + $0x48] sm:$0xff]  ;;  %v31_v8 = vld [vmem:[%s395_s1 + $0x40] sm:$0xff]  ;;  %v30_v9 = vld [vmem:[%s395_s1 + $0x38] sm:$0xff] }
   0x4   :  { %246 = vmatpush3.msra.mxu0 %v37_v2  ;;  %v29_v10 = vld [vmem:[%s395_s1 + $0x30] sm:$0xff]  ;;  %v28_v11 = vld [vmem:[%s395_s1 + $0x28] sm:$0xff]  ;;  %v27_v12 = vld [vmem:[%s395_s1 + $0x20] sm:$0xff]  ;;  %290 = vset.pattern.permute.xlu0 %v295_v21 }
   0x5   :  { %247 = vmatprep.subr.mxu0 %v293_v0  ;;  %v26_v13 = vld [vmem:[%s395_s1 + $0x18] sm:$0xff]  ;;  %v25_v14 = vld [vmem:[%s395_s1 + $0x10] sm:$0xff]  ;;  %v24_v15 = vld [vmem:[%s395_s1 + $0x8] sm:$0xff] }
   0x6   :  { %248 = vmatpush3.msra.mxu0 %v36_v3  ;;  %v23_v16 = vld [vmem:[%s395_s1] sm:$0xff]  ;;  %v119_v18 = vld [vmem:[%s397_s3 + $0x10] sm:$0xf]  ;;  %v118_v19 = vld [vmem:[%s397_s3 + $0x8] sm:$0xff] }
   0x7   :  { %249 = vmatprep.subr.mxu0 %v293_v0  ;;  %v22_v17 = vld [vmem:[%s396_s0] sm:$0xff]  ;;  %279 = vmatpush3.msk.msra.mxu1 %vm134_vm1, %v119_v18 }
   0x8   :  { %250 = vmatpush3.msra.mxu0 %v35_v4  ;;  %280 = vmatprep.subr.mxu1 %v293_v0  ;;  %v117_v20 = vld [vmem:[%s397_s3] sm:$0xff] }
   0x9   :  { %251 = vmatprep.subr.mxu0 %v293_v0  ;;  %281 = vmatpush3.msra.mxu1 %v118_v19  ;;  %v219_v23 = vld [vmem:[#allocation2] ss:$0 sm:$0xff] }
   0xa   :  { %252 = vmatpush3.msra.mxu0 %v34_v5  ;;  %282 = vmatprep.subr.mxu1 %v293_v0  ;;  %v218_v24 = vld [vmem:[%s399_s2] ss:$0 sm:$0xff] }
   0xb   :  { %253 = vmatprep.subr.mxu0 %v293_v0  ;;  %283 = vmatpush3.msra.mxu1 %v117_v20 }
   0xc   :  { %254 = vmatpush3.msra.mxu0 %v33_v6  ;;  %127 = vperm.xlu0 %290, %v219_v23  }
   0xd   :  { %255 = vmatprep.subr.mxu0 %v293_v0 }
   0xe   :  { %256 = vmatpush3.msra.mxu0 %v32_v7 }
   0xf   :  { %257 = vmatprep.subr.mxu0 %v293_v0 }
  0x10   :  { %258 = vmatpush3.msra.mxu0 %v31_v8 }
  0x11   :  { %259 = vmatprep.subr.mxu0 %v293_v0 }
  0x12   :  { %260 = vmatpush3.msra.mxu0 %v30_v9 }
  0x13   :  { %261 = vmatprep.subr.mxu0 %v293_v0 }
  0x14   :  { %262 = vmatpush3.msra.mxu0 %v29_v10 }
  0x15   :  { %263 = vmatprep.subr.mxu0 %v293_v0 }
  0x16   :  { %264 = vmatpush3.msra.mxu0 %v28_v11 }
  0x17   :  { %265 = vmatprep.subr.mxu0 %v293_v0 }
  0x18   :  { %266 = vmatpush3.msra.mxu0 %v27_v12 }
  0x19   :  { %267 = vmatprep.subr.mxu0 %v293_v0 }
  0x1a   :  { %268 = vmatpush3.msra.mxu0 %v26_v13 }
  0x1b   :  { %269 = vmatprep.subr.mxu0 %v293_v0 }
  0x1c   :  { %270 = vmatpush3.msra.mxu0 %v25_v14 }
  0x1d   :  { %271 = vmatprep.subr.mxu0 %v293_v0 }
  0x1e   :  { %272 = vmatpush3.msra.mxu0 %v24_v15 }
  0x1f   :  { %273 = vmatprep.subr.mxu0 %v293_v0 }
  0x20   :  { %274 = vmatpush3.msra.mxu0 %v23_v16 }
  0x21   :  { %276 = vmatmul.mubr.f32.vlgmr.msra.gmra.mxu0 %v22_v17 }
  0x87   :  { %v128_v29 = vpop.permute.xlu0 %127 }
  0xe1   :  { %v112_v25 = vpop.f32.mrf.mxu0 }
  0xe2   :  { %v113_v26 = vadd.f32 %v218_v24, %v112_v25 }
  0xe3   :  { %v277_v27 = vpop.f32.mrf.mxu0 }
  0xe4   :  { %v116_v28 = vmax.f32 %v113_v26, 0.0 }
  0xe6   :  { %285 = vmatmul.mubr.msk.f32.vlgmr.msra.gmra.mxu1 %vm130_vm2, %v116_v28 }
 0x1a6   :  { %v204_v30 = vpop.f32.mrf.mxu1 }
 0x1a7   :  { %v205_v31 = vadd.f32 %v204_v30, %v128_v29 }
 0x1a8   :  { %v286_v32 = vpop.f32.mrf.mxu1 }
 0x1a9   :  { %v208_v33 = vmax.f32 %v205_v31, 0.0 }
 0x1ab   :  { %v209_v34 = vsub.f32 0.0, %v208_v33 }
 0x1ad   :  { %v210_v35 = vmul.f32 1.442695, %v209_v34 }
 0x1af   :  { %291 = vpow2.f32 %v210_v35 }
 0x1bc   :  { %v292_v36 = vpop.eup %291 }
 0x1bd   :  { %213 = vst.msk [vmem:[%s400_s5] sm:$0xff] %vm212_vm3, %v292_v36 }

</bundles_post_ra>
